<compile_context>
chip_gen: v5e
topology: v5e:2x2
jax: 0.10.0
libtpu: 0.0.40
codegen_flags: <defaults>
</compile_context>

<pallas_src>
import functools

import jax
import jax.numpy as jnp
from jax import lax
from jax.experimental import pallas as pl
from jax.experimental.pallas import tpu as pltpu


def _pooled_size(size, k, s, ceil_mode):
    """PyTorch MaxPool2d output size (padding=0, dilation=1)."""
    if ceil_mode:
        out = -(-(size - k) // s) + 1
        # Last window must start strictly inside the input.
        if (out - 1) * s >= size:
            out -= 1
    else:
        out = (size - k) // s + 1
    return max(out, 0)


def _maxpool2d_xla(x, k, s, Hout, Wout):
    """Small-input / unsupported-geometry fallback via lax.reduce_window."""
    H, W = x.shape[2], x.shape[3]
    ph = max(0, (Hout - 1) * s + k - H)
    pw = max(0, (Wout - 1) * s + k - W)
    if jnp.issubdtype(x.dtype, jnp.floating):
        init = jnp.array(-jnp.inf, dtype=x.dtype)
    else:
        init = jnp.array(jnp.iinfo(x.dtype).min, dtype=x.dtype)
    xp = x
    if ph or pw:
        xp = jnp.pad(x, ((0, 0), (0, 0), (0, ph), (0, pw)), constant_values=init)
    return lax.reduce_window(xp, init, lax.max, (1, 1, k, k), (1, 1, s, s), "VALID")


def _maxpool_kernel(x_ref, o_ref, scr_ref, *, k, s, W, Wout, H_blk, Hout_blk):
    """Pool one (H_blk*W, tile_bc) block into (Hout_blk*Wout, tile_bc).

    All geometry is static; Python loops unroll at trace time.  Every max is an
    elementwise jnp.maximum over lane-dense slices (pure VPU work).
    """
    Wsc = (Wout - 1) * s + k          # column stage reads scratch rows [0, Wsc)
    CH = 8                            # one sublane group per chunk -> tiny live set

    for oh in range(Hout_blk):
        h0 = oh * s
        h1 = min(h0 + k, H_blk)       # ceil_mode: truncate the last row window

        # ---- Stage 1: row-max of the window, written to scratch in <=8-row chunks.
        for c0 in range(0, W, CH):
            clen = min(CH, W - c0)
            acc = x_ref[pl.ds(h0 * W + c0, clen), :]
            for h in range(h0 + 1, h1):
                acc = jnp.maximum(acc, x_ref[pl.ds(h * W + c0, clen), :])
            scr_ref[pl.ds(c0, clen), :] = acc

        # ---- ceil_mode column tail: replicate the last valid column so the
        # strided reads of the truncated final window stay in-bounds without
        # changing the max (row W-1 is already inside that window).
        if Wsc > W:
            last = scr_ref[pl.ds(W - 1, 1), :]
            scr_ref[pl.ds(W, Wsc - W), :] = jnp.broadcast_to(
                last, (Wsc - W, last.shape[1]))

        # ---- Stage 2: column-max via k strided sublane reads of the scratch;
        # one full-lane store per <=8 output columns (no per-column masked stores).
        for c0 in range(0, Wout, CH):
            clen = min(CH, Wout - c0)
            cm = scr_ref[pl.ds(c0 * s, clen, stride=s), :]
            for off in range(1, k):
                cm = jnp.maximum(cm, scr_ref[pl.ds(c0 * s + off, clen, stride=s), :])
            o_ref[pl.ds(oh * Wout + c0, clen), :] = cm


def maxpool2d_ceil(x, kernel_size=3, stride=None, ceil_mode=True, *,
                   xla_fallback_elems=65536,
                   tile_vmem_budget=16 * 1024 * 1024):
    """torch.nn.MaxPool2d(kernel_size, ceil_mode=ceil_mode) on NCHW input."""
    if stride is None:
        stride = kernel_size
    k, s = int(kernel_size), int(stride)
    N, C, H, W = x.shape
    Hout = _pooled_size(H, k, s, ceil_mode)
    Wout = _pooled_size(W, k, s, ceil_mode)
    bc = N * C
    itemsize = jnp.dtype(x.dtype).itemsize

    # Tiny inputs: pallas_call dispatch + the NCHW<->lane-dense relayout dwarf
    # the (memory-bound) pool itself; plain XLA is faster there.
    if bc * H * W < xla_fallback_elems:
        return _maxpool2d_xla(x, k, s, Hout, Wout)

    LANE, SUB = 128, 8
    bc_pad = -(-bc // LANE) * LANE

    def dbuf_bytes(hout_b, h_b, lanes):
        # double-buffered input + output tile bytes for `lanes` lanes.
        return 2 * (h_b * W + hout_b * Wout) * lanes * itemsize

    # ---- Output-row (H) tiling: needed when one 128-lane column of the full
    # spatial extent no longer fits the VMEM budget (bites first on v7x).
    if dbuf_bytes(Hout, H, LANE) <= tile_vmem_budget:
        grid_h, Hout_blk, H_blk, H_pad = 1, Hout, H, H
    elif s >= k and Hout > SUB:
        # Multiples of 8 keep both block row-counts (Hout_blk*s*W, Hout_blk*Wout)
        # 8-aligned; stride >= kernel means H blocks need no halo.
        Hout_blk = SUB
        while (Hout_blk + SUB < Hout and
               dbuf_bytes(Hout_blk + SUB, (Hout_blk + SUB) * s, LANE)
               <= tile_vmem_budget):
            Hout_blk += SUB
        if dbuf_bytes(Hout_blk, Hout_blk * s, LANE) > tile_vmem_budget:
            # TODO(synk): add column (W) tiling for extremely wide rows.
            return _maxpool2d_xla(x, k, s, Hout, Wout)
        grid_h = -(-Hout // Hout_blk)
        H_blk = Hout_blk * s
        H_pad = grid_h * H_blk
    else:
        # TODO(synk): overlapping windows (stride < kernel) need halo H-blocks.
        return _maxpool2d_xla(x, k, s, Hout, Wout)

    # ---- BC (lane) tile: as large as the budget allows (longer DMA bursts,
    # fewer grid steps), capped for vreg pressure, >=2 tiles where possible so
    # the "parallel" axes can shard across v7x's two TensorCores.
    per_lane = (H_blk * W + Hout_blk * Wout) * itemsize
    max_lanes = (tile_vmem_budget // (2 * per_lane)) // LANE * LANE
    cap = 2048 if itemsize >= 4 else 1024      # packed dtypes: keep vregs in check
    tile_bc = max(LANE, min(bc_pad, cap, max_lanes))
    if grid_h == 1 and tile_bc == bc_pad and bc_pad >= 2 * LANE:
        tile_bc = -(-(bc_pad // 2) // LANE) * LANE
    while bc_pad % tile_bc:
        tile_bc -= LANE
    grid_bc = bc_pad // tile_bc

    # ---- Relayout: NCHW -> lane-dense (H*W, N*C).
    # TODO(synk): keeping surrounding activations channels-last removes these
    # two HBM relayout passes, which cost more than the pool itself.
    x_l = jnp.transpose(x.reshape(bc, H, W), (1, 2, 0))            # (H, W, bc)
    if H_pad > H:
        # Edge-replicate: row H-1 is already in the last (truncated) window, so
        # duplicating it never changes a valid output; extra rows are trimmed.
        x_l = jnp.pad(x_l, ((0, H_pad - H), (0, 0), (0, 0)), mode="edge")
    x_l = x_l.reshape(H_pad * W, bc)
    if bc_pad > bc:
        x_l = jnp.pad(x_l, ((0, 0), (0, bc_pad - bc)))             # padded lanes dropped below

    Wsc = (Wout - 1) * s + k
    scratch_rows = max(W, Wsc)
    R_in, R_out = H_blk * W, Hout_blk * Wout

    vmem_need = 2 * per_lane * tile_bc + scratch_rows * tile_bc * itemsize
    vmem_limit = int(min(max(vmem_need + (4 << 20), 32 << 20), 60 << 20))

    kernel = functools.partial(_maxpool_kernel, k=k, s=s, W=W, Wout=Wout,
                               H_blk=H_blk, Hout_blk=Hout_blk)

    out_flat = pl.pallas_call(
        kernel,
        out_shape=jax.ShapeDtypeStruct((grid_h * R_out, bc_pad), x.dtype),
        grid=(grid_h, grid_bc),
        in_specs=[pl.BlockSpec((R_in, tile_bc), lambda h, i: (h, i))],
        out_specs=pl.BlockSpec((R_out, tile_bc), lambda h, i: (h, i)),
        scratch_shapes=[pltpu.VMEM((scratch_rows, tile_bc), x.dtype)],
        compiler_params=pltpu.CompilerParams(
            dimension_semantics=("parallel", "parallel"),
            vmem_limit_bytes=vmem_limit,
        ),
    )(x_l)

    out = out_flat[: Hout * Wout, :bc].reshape(Hout, Wout, bc)
    return jnp.transpose(out, (2, 0, 1)).reshape(N, C, Hout, Wout)


def _maxpool2d_ref(x, k=3, s=3, ceil_mode=True):
    """Pure-JAX reference matching PyTorch MaxPool2d(padding=0) semantics."""
    N, C, H, W = x.shape
    Hout = _pooled_size(H, k, s, ceil_mode)
    Wout = _pooled_size(W, k, s, ceil_mode)
    rows = []
    for oh in range(Hout):
        cols = []
        for ow in range(Wout):
            h0, w0 = oh * s, ow * s
            win = x[:, :, h0:min(h0 + k, H), w0:min(w0 + k, W)]
            cols.append(jnp.max(win, axis=(2, 3)))
        rows.append(jnp.stack(cols, axis=-1))
    return jnp.stack(rows, axis=-2)


if __name__ == "__main__":
    key = jax.random.PRNGKey(0)
    k1, k2, k3, k4 = jax.random.split(key, 4)

    # 1) The module's own shape: torch.rand(5, 5).reshape(-1, 1, 5, 5).
    x1 = jax.random.uniform(k1, (1, 1, 5, 5), dtype=jnp.float32)
    o1 = jax.block_until_ready(maxpool2d_ceil(x1, xla_fallback_elems=0))
    assert o1.shape == (1, 1, 2, 2), o1.shape
    assert jnp.allclose(o1, _maxpool2d_ref(x1))

    # 2) Lane padding + ceil_mode truncation on both axes.
    x2 = jax.random.uniform(k2, (2, 4, 16, 16), dtype=jnp.float32)
    o2 = jax.block_until_ready(maxpool2d_ceil(x2, xla_fallback_elems=0))
    assert o2.shape == (2, 4, 6, 6), o2.shape
    assert jnp.allclose(o2, _maxpool2d_ref(x2))

    # 3) Multiple BC tiles (grid_bc == 2: exercises the >=2-tile megacore rule).
    x3 = jax.random.uniform(k3, (8, 32, 20, 20), dtype=jnp.float32)
    o3 = jax.block_until_ready(maxpool2d_ceil(x3, xla_fallback_elems=0))
    assert o3.shape == (8, 32, 7, 7), o3.shape
    assert jnp.allclose(o3, _maxpool2d_ref(x3))

    # 4) Output-row (H) tiling path, forced via a small VMEM budget: grid_h == 2,
    #    edge-replicated row padding, trimmed padded output rows.
    x4 = jax.random.uniform(k4, (2, 2, 44, 24), dtype=jnp.float32)
    o4 = jax.block_until_ready(
        maxpool2d_ceil(x4, xla_fallback_elems=0, tile_vmem_budget=1 << 20))
    assert o4.shape == (2, 2, 15, 8), o4.shape
    assert jnp.allclose(o4, _maxpool2d_ref(x4))

    # 5) Small-input XLA fallback (default threshold).
    o5 = jax.block_until_ready(maxpool2d_ceil(x1))
    assert jnp.allclose(o5, _maxpool2d_ref(x1))

    print("KERNEL_OK")
</pallas_src>

<mosaic_0001>
module attributes {stable_mosaic.version = 11 : i64} {
  func.func @_maxpool_kernel(%arg0: i32, %arg1: i32, %arg2: memref<25x128xf32, #tpu.memory_space<vmem>>, %arg3: memref<4x128xf32, #tpu.memory_space<vmem>>, %arg4: memref<6x128xf32, #tpu.memory_space<vmem>>) attributes {dimension_semantics = [#tpu.dimension_semantics<parallel>, #tpu.dimension_semantics<parallel>], iteration_bounds = array<i64: 1, 1>, scalar_prefetch = 0 : i64, scratch_operands = 1 : i64, tpu.core_type = #tpu.core_type<tc>, window_params = [{transform_indices = @transform_0, window_bounds = array<i64: 25, 128>}, {transform_indices = @transform_1, window_bounds = array<i64: 4, 128>}]} {
    %c0 = arith.constant 0 : index
    %c0_0 = arith.constant 0 : index
    %0 = vector.load %arg2[%c0, %c0_0] : memref<25x128xf32, #tpu.memory_space<vmem>>, vector<5x128xf32>
    %c5 = arith.constant 5 : index
    %c0_1 = arith.constant 0 : index
    %1 = vector.load %arg2[%c5, %c0_1] : memref<25x128xf32, #tpu.memory_space<vmem>>, vector<5x128xf32>
    %2 = arith.maximumf %0, %1 : vector<5x128xf32>
    %c10 = arith.constant 10 : index
    %c0_2 = arith.constant 0 : index
    %3 = vector.load %arg2[%c10, %c0_2] : memref<25x128xf32, #tpu.memory_space<vmem>>, vector<5x128xf32>
    %4 = arith.maximumf %2, %3 : vector<5x128xf32>
    %c0_3 = arith.constant 0 : index
    %c0_4 = arith.constant 0 : index
    %5 = vector.load %arg4[%c0_3, %c0_4] : memref<6x128xf32, #tpu.memory_space<vmem>>, vector<5x128xf32>
    tpu.vector_store %arg4[%c0_3, %c0_4], %4 {strides = array<i32>} : memref<6x128xf32, #tpu.memory_space<vmem>>, vector<5x128xf32>,
    %c4 = arith.constant 4 : index
    %c0_5 = arith.constant 0 : index
    %6 = vector.load %arg4[%c4, %c0_5] : memref<6x128xf32, #tpu.memory_space<vmem>>, vector<1x128xf32>
    %c5_6 = arith.constant 5 : index
    %c0_7 = arith.constant 0 : index
    %7 = vector.load %arg4[%c5_6, %c0_7] : memref<6x128xf32, #tpu.memory_space<vmem>>, vector<1x128xf32>
    tpu.vector_store %arg4[%c5_6, %c0_7], %6 {strides = array<i32>} : memref<6x128xf32, #tpu.memory_space<vmem>>, vector<1x128xf32>,
    %c0_8 = arith.constant 0 : index
    %c0_9 = arith.constant 0 : index
    %8 = tpu.strided_load %arg4[%c0_8, %c0_9] {strides = array<i32: 3, 1>} : memref<6x128xf32, #tpu.memory_space<vmem>>, vector<2x128xf32>
    %c1 = arith.constant 1 : index
    %c0_10 = arith.constant 0 : index
    %9 = tpu.strided_load %arg4[%c1, %c0_10] {strides = array<i32: 3, 1>} : memref<6x128xf32, #tpu.memory_space<vmem>>, vector<2x128xf32>
    %10 = arith.maximumf %8, %9 : vector<2x128xf32>
    %c2 = arith.constant 2 : index
    %c0_11 = arith.constant 0 : index
    %11 = tpu.strided_load %arg4[%c2, %c0_11] {strides = array<i32: 3, 1>} : memref<6x128xf32, #tpu.memory_space<vmem>>, vector<2x128xf32>
    %12 = arith.maximumf %10, %11 : vector<2x128xf32>
    %c0_12 = arith.constant 0 : index
    %c0_13 = arith.constant 0 : index
    %13 = vector.load %arg3[%c0_12, %c0_13] : memref<4x128xf32, #tpu.memory_space<vmem>>, vector<2x128xf32>
    tpu.vector_store %arg3[%c0_12, %c0_13], %12 {strides = array<i32>} : memref<4x128xf32, #tpu.memory_space<vmem>>, vector<2x128xf32>,
    %c15 = arith.constant 15 : index
    %c0_14 = arith.constant 0 : index
    %14 = vector.load %arg2[%c15, %c0_14] : memref<25x128xf32, #tpu.memory_space<vmem>>, vector<5x128xf32>
    %c20 = arith.constant 20 : index
    %c0_15 = arith.constant 0 : index
    %15 = vector.load %arg2[%c20, %c0_15] : memref<25x128xf32, #tpu.memory_space<vmem>>, vector<5x128xf32>
    %16 = arith.maximumf %14, %15 : vector<5x128xf32>
    %c0_16 = arith.constant 0 : index
    %c0_17 = arith.constant 0 : index
    %17 = vector.load %arg4[%c0_16, %c0_17] : memref<6x128xf32, #tpu.memory_space<vmem>>, vector<5x128xf32>
    tpu.vector_store %arg4[%c0_16, %c0_17], %16 {strides = array<i32>} : memref<6x128xf32, #tpu.memory_space<vmem>>, vector<5x128xf32>,
    %c4_18 = arith.constant 4 : index
    %c0_19 = arith.constant 0 : index
    %18 = vector.load %arg4[%c4_18, %c0_19] : memref<6x128xf32, #tpu.memory_space<vmem>>, vector<1x128xf32>
    %c5_20 = arith.constant 5 : index
    %c0_21 = arith.constant 0 : index
    %19 = vector.load %arg4[%c5_20, %c0_21] : memref<6x128xf32, #tpu.memory_space<vmem>>, vector<1x128xf32>
    tpu.vector_store %arg4[%c5_20, %c0_21], %18 {strides = array<i32>} : memref<6x128xf32, #tpu.memory_space<vmem>>, vector<1x128xf32>,
    %c0_22 = arith.constant 0 : index
    %c0_23 = arith.constant 0 : index
    %20 = tpu.strided_load %arg4[%c0_22, %c0_23] {strides = array<i32: 3, 1>} : memref<6x128xf32, #tpu.memory_space<vmem>>, vector<2x128xf32>
    %c1_24 = arith.constant 1 : index
    %c0_25 = arith.constant 0 : index
    %21 = tpu.strided_load %arg4[%c1_24, %c0_25] {strides = array<i32: 3, 1>} : memref<6x128xf32, #tpu.memory_space<vmem>>, vector<2x128xf32>
    %22 = arith.maximumf %20, %21 : vector<2x128xf32>
    %c2_26 = arith.constant 2 : index
    %c0_27 = arith.constant 0 : index
    %23 = tpu.strided_load %arg4[%c2_26, %c0_27] {strides = array<i32: 3, 1>} : memref<6x128xf32, #tpu.memory_space<vmem>>, vector<2x128xf32>
    %24 = arith.maximumf %22, %23 : vector<2x128xf32>
    %c2_28 = arith.constant 2 : index
    %c0_29 = arith.constant 0 : index
    %25 = vector.load %arg3[%c2_28, %c0_29] : memref<4x128xf32, #tpu.memory_space<vmem>>, vector<2x128xf32>
    tpu.vector_store %arg3[%c2_28, %c0_29], %24 {strides = array<i32>} : memref<4x128xf32, #tpu.memory_space<vmem>>, vector<2x128xf32>,
    return
  }
  func.func @transform_0(%arg0: i32, %arg1: i32) -> (i32, i32) {
    %c0_i32 = arith.constant 0 : i32
    return %arg0, %arg1 : i32, i32
  }
  func.func @transform_1(%arg0: i32, %arg1: i32) -> (i32, i32) {
    %c0_i32 = arith.constant 0 : i32
    return %arg0, %arg1 : i32, i32
  }
}

</mosaic_0001>

<bundles_post_ra>
// kernel: tpu_custom_call.1
= control target key start
LH: loop header
LB: loop body
LE: loop exit
PB: predicated region body
PF: predicated region fallthrough
CT: control target
= control target key end

     0   :  { %6 = vsyncpa [#allocation4], 0  ;;  %s146_s0 = inlined_call_operand.hbm [shape: f32[25,128], index: 0, kind: input, shape index: {}]   ;;  %s147_s1 = inlined_call_operand.hbm [shape: f32[4,128], index: 1, kind: output, shape index: {}]  }
   0x1   :  { %7 = vsyncpa [#allocation5], 0  ;;  %s12_s8 = sshll.u32 %s146_s0, 4  ;;  %s126_s9 = smov [#allocation3]   ;;  %s13_s8 = int_to_ptr.hbm [resolvable:$true] %s12_s8 }
   0x2   :  { %s14_s10 = sshll.u32 %s126_s9, 4  ;;  %s127_s11 = smov 128   ;;  %s15_s10 = int_to_ptr.vmem [resolvable:$true] %s14_s10 }
   0x3   :  { %s128_s12 = smov 8  }
   0x4   :  { %20 = dma.hbm_to_vmem [thread:$0]  %s13_s8, 512, %s15_s10, [#allocation4], %s127_s11, %s127_s11, %s128_s12  }
   0x5   :  { %122 = dma.done.wait [#allocation4], 512  }
   0x6   :  { %123 = vsyncadd [#allocation4], 4294966784  ;;  %v25_v0 = vld [vmem:[#allocation3] sm:$0x1f]  ;;  %v26_v1 = vld [vmem:[#allocation3 + $0x5] sm:$0x1f] }
   0x7   :  { %v28_v2 = vld [vmem:[#allocation3 + $0xa] sm:$0x1f]  ;;  %v27_v3 = vmax.f32 %v25_v0, %v26_v1  ;;  %v41_v6 = vld [vmem:[#allocation3 + $0xf] sm:$0x1f]  ;;  %v42_v7 = vld [vmem:[#allocation3 + $0x14] sm:$0x1f] }
   0x8   :  { %v43_v10 = vmax.f32 %v41_v6, %v42_v7  ;;  %s129_s0 = smov [#allocation6]   ;;  %s60_s16 = sshll.u32 %s147_s1, 4  ;;  %s61_s16 = int_to_ptr.hbm [resolvable:$true] %s60_s16 }
   0x9   :  { %v29_v4 = vmax.f32 %v27_v3, %v28_v2  ;;  %s58_s13 = sshll.u32 %s129_s0, 4  ;;  %s59_s13 = int_to_ptr.vmem [resolvable:$true] %s58_s13 }
   0xb   :  { %30 = vst [vmem:[#allocation2] sm:$0x1f] %v29_v4 }
  0x12   :  { %v31_v5 = vld [vmem:[#allocation2 + $0x4] sm:$0x1]  ;;  %v33_v8 = vld [vmem:[#allocation2] ss:$3 sm:$0x3] }
  0x13   :  { %32 = vst [vmem:[#allocation2 + $0x5] sm:$0x1] %v31_v5  ;;  %v35_v9 = vld [vmem:[#allocation2 + $0x1] ss:$3 sm:$0x3] }
  0x14   :  { %v36_v11 = vmax.f32 %v33_v8, %v35_v9 }
  0x1a   :  { %v38_v12 = vld [vmem:[#allocation2 + $0x2] ss:$3 sm:$0x3] }
  0x1b   :  { %44 = vst [vmem:[#allocation2] sm:$0x1f] %v43_v10  ;;  %v39_v13 = vmax.f32 %v36_v11, %v38_v12 }
  0x1d   :  { %40 = vst [vmem:[#allocation6] sm:$0x3] %v39_v13 }
  0x22   :  { %v45_v14 = vld [vmem:[#allocation2 + $0x4] sm:$0x1]  ;;  %v47_v15 = vld [vmem:[#allocation2] ss:$3 sm:$0x3] }
  0x23   :  { %46 = vst [vmem:[#allocation2 + $0x5] sm:$0x1] %v45_v14  ;;  %v48_v16 = vld [vmem:[#allocation2 + $0x1] ss:$3 sm:$0x3] }
  0x24   :  { %v49_v17 = vmax.f32 %v47_v15, %v48_v16 }
  0x2a   :  { %v50_v18 = vld [vmem:[#allocation2 + $0x2] ss:$3 sm:$0x3] }
  0x2b   :  { %v51_v19 = vmax.f32 %v49_v17, %v50_v18 }
  0x2d   :  { %52 = vst [vmem:[#allocation6 + $0x2] sm:$0x3] %v51_v19 }
  0x2e   :  { %63 = dma.vmem_to_hbm [thread:$0]  %s59_s13, 64, %s61_s16, [#allocation5]  }
  0x2f   :  { %124 = dma.done.wait [#allocation5], 64  }
  0x30   :  { %125 = vsyncadd [#allocation5], 4294967232 }
  0x31   :  { %68 = vsyncpa [#allocation4], 1 }
  0x32   :  { %69 = vsyncpa [#allocation5], 1 }

</bundles_post_ra>
